<compile_context>
chip_gen: v7x
topology: tpu7x:2x2x1
jax: 0.10.0
libtpu: 0.0.40
codegen_flags: <defaults>
</compile_context>

<pallas_src>
import jax
import jax.numpy as jnp
from jax.experimental import pallas as pl
from jax.experimental.pallas import tpu as pltpu


# ----------------------------- parameter / table setup (glue, plain JAX) ----

def compute_inv_freq(dim: int, base: float, math_enhanced: bool = True) -> jnp.ndarray:
    """Mirror of RotaryPositionalEmbedding._compute_inv_freq."""
    if math_enhanced:
        assert dim % 8 == 0, "math_enhanced RoPE requires head_dim divisible by 8"
        d4 = dim // 4
        f = jnp.arange(0, d4, 2, dtype=jnp.float32)          # dim // 8 entries
        inv_low   = 1.0 / jnp.power(base,        f / d4)
        inv_mid   = 1.0 / jnp.power(base * 2.0,  f / d4)
        inv_high  = 1.0 / jnp.power(base * 5.0,  f / d4)
        inv_ultra = 1.0 / jnp.power(base * 10.0, f / d4)
        return jnp.concatenate([inv_low, inv_mid, inv_high, inv_ultra])  # (dim//2,)
    freqs = jnp.arange(0, dim, 2, dtype=jnp.float32)
    return 1.0 / jnp.power(base, freqs / dim)


def compute_cos_sin(seq_len: int,
                    inv_freq: jnp.ndarray,
                    freq_enhancement: jnp.ndarray,
                    position_scaling: jnp.ndarray,
                    scaling_factor: float):
    """Mirror of RotaryPositionalEmbedding._get_cos_sin (math_enhanced path).

    Returns full (S, D) tables (as PyTorch does).  The kernel only consumes
    the first half of each table since cos[:, :D/2] == cos[:, D/2:].
    """
    positions = jnp.arange(seq_len, dtype=jnp.float32) * scaling_factor
    positions = positions * position_scaling[0]
    inv = inv_freq * freq_enhancement
    freqs = jnp.outer(positions, inv)                     # (S, D//2)
    freqs = jnp.concatenate([freqs, freqs], axis=-1)      # (S, D)
    return jnp.cos(freqs), jnp.sin(freqs)


# ----------------------------- Pallas kernel (hot path) ---------------------

def rope_kernel(cos_ref, sin_ref, q_ref, k_ref, qo_ref, ko_ref):
    """Applies RoPE on one (TBH, TS, D) tile using the half-split identity."""
    c = cos_ref[...]                                  # (TS, D//2) f32
    s = sin_ref[...]                                  # (TS, D//2) f32
    q = q_ref[...].astype(jnp.float32)                # (TBH, TS, D)
    k = k_ref[...].astype(jnp.float32)
    d_half = c.shape[-1]

    q1, q2 = q[..., :d_half], q[..., d_half:]
    k1, k2 = k[..., :d_half], k[..., d_half:]

    # out = x*cos + rotate_half(x)*sin, written as two half-width FMAs and a
    # single full-width store (no roll, no sign mask, no partial stores).
    qo = jnp.concatenate([q1 * c - q2 * s, q2 * c + q1 * s], axis=-1)
    ko = jnp.concatenate([k1 * c - k2 * s, k2 * c + k1 * s], axis=-1)

    qo_ref[...] = qo.astype(qo_ref.dtype)
    ko_ref[...] = ko.astype(ko_ref.dtype)


# ----------------------------- tiling helpers --------------------------------

def _largest_divisor(n: int, cap: int, multiple_of: int = 1) -> int:
    """Largest divisor of n that is <= cap and a multiple of `multiple_of`."""
    cap = max(multiple_of, min(n, cap))
    for d in range(cap, 0, -1):
        if n % d == 0 and d % multiple_of == 0:
            return d
    return n


def rope_apply(query: jnp.ndarray, key: jnp.ndarray,
               cos: jnp.ndarray, sin: jnp.ndarray,
               *, target_block_bytes: int = 1 << 20):
    """query/key: [B, H, S, D]; cos/sin: [S, D]. Returns rotated (q, k)."""
    B, H, S, D = query.shape
    BH = B * H
    d_half = D // 2

    qf = query.reshape(BH, S, D)       # free reshape (contiguous)
    kf = key.reshape(BH, S, D)
    cos_h = cos[:, :d_half]            # halves of the table are identical
    sin_h = sin[:, :d_half]

    itemsize = jnp.dtype(query.dtype).itemsize
    row_bytes = S * D * itemsize

    # Pick block sizes: big enough (~1 MiB) to amortize per-step overhead,
    # small enough to fit v7x's 64 MiB VMEM with double buffering intact.
    if row_bytes <= target_block_bytes:
        TS = S
        TBH = _largest_divisor(BH, max(1, target_block_bytes // row_bytes))
        # Keep >=2 blocks along the parallel B*H axis so v7x's two TensorCores
        # both get work.
        if BH >= 2 and TBH == BH:
            TBH = _largest_divisor(BH, max(1, BH // 2))
    else:
        TBH = 1
        if S % 8 == 0:
            cap_rows = max(8, target_block_bytes // (D * itemsize))
            TS = _largest_divisor(S, cap_rows, multiple_of=8)
        else:
            TS = S  # fall back to full-S block (satisfies the (8,128) rule)

    grid = (BH // TBH, S // TS)

    qk_spec = pl.BlockSpec((TBH, TS, D), lambda i, j: (i, j, 0))
    cs_spec = pl.BlockSpec((TS, d_half), lambda i, j: (j, 0))

    qo, ko = pl.pallas_call(
        rope_kernel,
        out_shape=(jax.ShapeDtypeStruct((BH, S, D), query.dtype),
                   jax.ShapeDtypeStruct((BH, S, D), key.dtype)),
        grid_spec=pltpu.PrefetchScalarGridSpec(
            num_scalar_prefetch=0,
            grid=grid,
            in_specs=[cs_spec, cs_spec, qk_spec, qk_spec],
            out_specs=[qk_spec, qk_spec],
        ),
        compiler_params=pltpu.CompilerParams(
            dimension_semantics=("parallel", "parallel")),
    )(cos_h, sin_h, qf, kf)

    return qo.reshape(B, H, S, D), ko.reshape(B, H, S, D)


# ----------------------------- pure-JAX reference ---------------------------

def _rotate_half_ref(x):
    x1, x2 = jnp.split(x, 2, axis=-1)
    return jnp.concatenate([-x2, x1], axis=-1)


def rope_ref(query, key, cos, sin):
    cos = cos[None, None]  # (1,1,S,D)
    sin = sin[None, None]
    q_embed = query * cos + _rotate_half_ref(query) * sin
    k_embed = key * cos + _rotate_half_ref(key) * sin
    return q_embed, k_embed


# ----------------------------- main ------------------------------------------

if __name__ == "__main__":
    # Module config (math_enhanced=True, defaults otherwise)
    dim = 32
    base = 10000.0
    scaling_factor = 1.0

    # Deterministic parameter init exactly as in __init__ (nn.Parameter(torch.ones(...)))
    freq_enhancement = jnp.ones((dim // 2,), dtype=jnp.float32)
    position_scaling = jnp.ones((1,), dtype=jnp.float32)
    inv_freq = compute_inv_freq(dim, base, math_enhanced=True)

    # Small example shapes: [batch=2, heads=4, seq=8, head_dim=32]
    B, H, S, D = 2, 4, 8, dim
    key0 = jax.random.PRNGKey(0)
    kq, kk = jax.random.split(key0)
    query = jax.random.normal(kq, (B, H, S, D), dtype=jnp.float32)
    key_t = jax.random.normal(kk, (B, H, S, D), dtype=jnp.float32)

    # TODO(synk): the module's use_cache (host-side cos/sin cache) is Python
    # state; here the tables are just computed once per call in the wrapper.
    cos, sin = compute_cos_sin(S, inv_freq, freq_enhancement,
                               position_scaling, scaling_factor)

    q_out, k_out = rope_apply(query, key_t, cos, sin)
    jax.block_until_ready((q_out, k_out))

    # Correctness check against pure-JAX reference of the PyTorch semantics
    q_ref, k_ref = rope_ref(query, key_t, cos, sin)
    assert jnp.allclose(q_out, q_ref, atol=1e-5, rtol=1e-5)
    assert jnp.allclose(k_out, k_ref, atol=1e-5, rtol=1e-5)

    print("KERNEL_OK")
</pallas_src>

<mosaic_0001>
module attributes {stable_mosaic.version = 11 : i64} {
  func.func @rope_kernel(%arg0: i32, %arg1: i32, %arg2: memref<8x16xf32, #tpu.memory_space<vmem>>, %arg3: memref<8x16xf32, #tpu.memory_space<vmem>>, %arg4: memref<4x8x32xf32, #tpu.memory_space<vmem>>, %arg5: memref<4x8x32xf32, #tpu.memory_space<vmem>>, %arg6: memref<4x8x32xf32, #tpu.memory_space<vmem>>, %arg7: memref<4x8x32xf32, #tpu.memory_space<vmem>>) attributes {dimension_semantics = [#tpu.dimension_semantics<parallel>, #tpu.dimension_semantics<parallel>], iteration_bounds = array<i64: 2, 1>, scalar_prefetch = 0 : i64, scratch_operands = 0 : i64, tpu.core_type = #tpu.core_type<tc>, window_params = [{transform_indices = @transform_0, window_bounds = array<i64: 8, 16>}, {transform_indices = @transform_1, window_bounds = array<i64: 8, 16>}, {transform_indices = @transform_2, window_bounds = array<i64: 4, 8, 32>}, {transform_indices = @transform_3, window_bounds = array<i64: 4, 8, 32>}, {transform_indices = @transform_4, window_bounds = array<i64: 4, 8, 32>}, {transform_indices = @transform_5, window_bounds = array<i64: 4, 8, 32>}]} {
    %c0 = arith.constant 0 : index
    %c0_0 = arith.constant 0 : index
    %0 = vector.load %arg2[%c0, %c0_0] : memref<8x16xf32, #tpu.memory_space<vmem>>, vector<8x16xf32>
    %c0_1 = arith.constant 0 : index
    %c0_2 = arith.constant 0 : index
    %1 = vector.load %arg3[%c0_1, %c0_2] : memref<8x16xf32, #tpu.memory_space<vmem>>, vector<8x16xf32>
    %c0_3 = arith.constant 0 : index
    %c0_4 = arith.constant 0 : index
    %c0_5 = arith.constant 0 : index
    %2 = vector.load %arg4[%c0_3, %c0_4, %c0_5] : memref<4x8x32xf32, #tpu.memory_space<vmem>>, vector<4x8x32xf32>
    %c0_6 = arith.constant 0 : index
    %c0_7 = arith.constant 0 : index
    %c0_8 = arith.constant 0 : index
    %3 = vector.load %arg5[%c0_6, %c0_7, %c0_8] : memref<4x8x32xf32, #tpu.memory_space<vmem>>, vector<4x8x32xf32>
    %4 = vector.extract_strided_slice %2 {offsets = [0, 0, 0], sizes = [4, 8, 16], strides = [1, 1, 1]} : vector<4x8x32xf32> to vector<4x8x16xf32>
    %5 = vector.extract_strided_slice %2 {offsets = [0, 0, 16], sizes = [4, 8, 16], strides = [1, 1, 1]} : vector<4x8x32xf32> to vector<4x8x16xf32>
    %6 = vector.extract_strided_slice %3 {offsets = [0, 0, 0], sizes = [4, 8, 16], strides = [1, 1, 1]} : vector<4x8x32xf32> to vector<4x8x16xf32>
    %7 = vector.extract_strided_slice %3 {offsets = [0, 0, 16], sizes = [4, 8, 16], strides = [1, 1, 1]} : vector<4x8x32xf32> to vector<4x8x16xf32>
    %8 = vector.shape_cast %0 : vector<8x16xf32> to vector<1x8x16xf32>
    %9 = vector.broadcast %8 : vector<1x8x16xf32> to vector<4x8x16xf32>
    %10 = arith.mulf %4, %9 : vector<4x8x16xf32>
    %11 = vector.shape_cast %1 : vector<8x16xf32> to vector<1x8x16xf32>
    %12 = vector.broadcast %11 : vector<1x8x16xf32> to vector<4x8x16xf32>
    %13 = arith.mulf %5, %12 : vector<4x8x16xf32>
    %14 = arith.subf %10, %13 : vector<4x8x16xf32>
    %15 = vector.shape_cast %0 : vector<8x16xf32> to vector<1x8x16xf32>
    %16 = vector.broadcast %15 : vector<1x8x16xf32> to vector<4x8x16xf32>
    %17 = arith.mulf %5, %16 : vector<4x8x16xf32>
    %18 = vector.shape_cast %1 : vector<8x16xf32> to vector<1x8x16xf32>
    %19 = vector.broadcast %18 : vector<1x8x16xf32> to vector<4x8x16xf32>
    %20 = arith.mulf %4, %19 : vector<4x8x16xf32>
    %21 = arith.addf %17, %20 : vector<4x8x16xf32>
    %22 = tpu.concatenate %14, %21 in 2 : vector<4x8x16xf32>, vector<4x8x16xf32> -> vector<4x8x32xf32>
    %23 = vector.shape_cast %0 : vector<8x16xf32> to vector<1x8x16xf32>
    %24 = vector.broadcast %23 : vector<1x8x16xf32> to vector<4x8x16xf32>
    %25 = arith.mulf %6, %24 : vector<4x8x16xf32>
    %26 = vector.shape_cast %1 : vector<8x16xf32> to vector<1x8x16xf32>
    %27 = vector.broadcast %26 : vector<1x8x16xf32> to vector<4x8x16xf32>
    %28 = arith.mulf %7, %27 : vector<4x8x16xf32>
    %29 = arith.subf %25, %28 : vector<4x8x16xf32>
    %30 = vector.shape_cast %0 : vector<8x16xf32> to vector<1x8x16xf32>
    %31 = vector.broadcast %30 : vector<1x8x16xf32> to vector<4x8x16xf32>
    %32 = arith.mulf %7, %31 : vector<4x8x16xf32>
    %33 = vector.shape_cast %1 : vector<8x16xf32> to vector<1x8x16xf32>
    %34 = vector.broadcast %33 : vector<1x8x16xf32> to vector<4x8x16xf32>
    %35 = arith.mulf %6, %34 : vector<4x8x16xf32>
    %36 = arith.addf %32, %35 : vector<4x8x16xf32>
    %37 = tpu.concatenate %29, %36 in 2 : vector<4x8x16xf32>, vector<4x8x16xf32> -> vector<4x8x32xf32>
    %c0_9 = arith.constant 0 : index
    %c0_10 = arith.constant 0 : index
    %c0_11 = arith.constant 0 : index
    %38 = vector.load %arg6[%c0_9, %c0_10, %c0_11] : memref<4x8x32xf32, #tpu.memory_space<vmem>>, vector<4x8x32xf32>
    tpu.vector_store %arg6[%c0_9, %c0_10, %c0_11], %22 {strides = array<i32>} : memref<4x8x32xf32, #tpu.memory_space<vmem>>, vector<4x8x32xf32>,
    %c0_12 = arith.constant 0 : index
    %c0_13 = arith.constant 0 : index
    %c0_14 = arith.constant 0 : index
    %39 = vector.load %arg7[%c0_12, %c0_13, %c0_14] : memref<4x8x32xf32, #tpu.memory_space<vmem>>, vector<4x8x32xf32>
    tpu.vector_store %arg7[%c0_12, %c0_13, %c0_14], %37 {strides = array<i32>} : memref<4x8x32xf32, #tpu.memory_space<vmem>>, vector<4x8x32xf32>,
    return
  }
  func.func @transform_0(%arg0: i32, %arg1: i32) -> (i32, i32) {
    %c0_i32 = arith.constant 0 : i32
    %c0_i32_0 = arith.constant 0 : i32
    return %arg1, %c0_i32 : i32, i32
  }
  func.func @transform_1(%arg0: i32, %arg1: i32) -> (i32, i32) {
    %c0_i32 = arith.constant 0 : i32
    %c0_i32_0 = arith.constant 0 : i32
    return %arg1, %c0_i32 : i32, i32
  }
  func.func @transform_2(%arg0: i32, %arg1: i32) -> (i32, i32, i32) {
    %c0_i32 = arith.constant 0 : i32
    %c0_i32_0 = arith.constant 0 : i32
    return %arg0, %arg1, %c0_i32 : i32, i32, i32
  }
  func.func @transform_3(%arg0: i32, %arg1: i32) -> (i32, i32, i32) {
    %c0_i32 = arith.constant 0 : i32
    %c0_i32_0 = arith.constant 0 : i32
    return %arg0, %arg1, %c0_i32 : i32, i32, i32
  }
  func.func @transform_4(%arg0: i32, %arg1: i32) -> (i32, i32, i32) {
    %c0_i32 = arith.constant 0 : i32
    %c0_i32_0 = arith.constant 0 : i32
    return %arg0, %arg1, %c0_i32 : i32, i32, i32
  }
  func.func @transform_5(%arg0: i32, %arg1: i32) -> (i32, i32, i32) {
    %c0_i32 = arith.constant 0 : i32
    %c0_i32_0 = arith.constant 0 : i32
    return %arg0, %arg1, %c0_i32 : i32, i32, i32
  }
}

</mosaic_0001>

<bundles_post_ra>
// kernel: tpu_custom_call.1
= control target key start
LH: loop header
LB: loop body
LE: loop exit
PB: predicated region body
PF: predicated region fallthrough
CT: control target
= control target key end

     0   :  { %s1551_s0 = inlined_call_operand.hbm [shape: f32[8,16], index: 0, kind: input, shape index: {}]   ;;  %s1552_s1 = inlined_call_operand.hbm [shape: f32[8,16], index: 1, kind: input, shape index: {}]   ;;  %s1553_s2 = inlined_call_operand.hbm [shape: f32[8,8,32], index: 2, kind: input, shape index: {}]   ;;  %s1554_s3 = inlined_call_operand.hbm [shape: f32[8,8,32], index: 3, kind: input, shape index: {}]   ;;  %s1555_s4 = inlined_call_operand.hbm [shape: f32[8,8,32], index: 4, kind: output, shape index: {0}]   ;;  %s1556_s5 = inlined_call_operand.hbm [shape: f32[8,8,32], index: 5, kind: output, shape index: {1}]  }
   0x1   :  { %1573 = sst [smem:[#allocation23_spill]] %s1551_s0 }
   0x2   :  { %1574 = sst [smem:[#allocation24_spill]] %s1553_s2 }
   0x3   :  { %1575 = sst [smem:[#allocation25_spill]] %s1556_s5 }
   0x4   :  { %11 = vsyncpa [#allocation3], 0 }
   0x5   :  { %12 = vsyncpa [#allocation6], 0 }
   0x6   :  { %13 = vsyncpa [#allocation4], 0 }
   0x7   :  { %15 = vsyncpa [#allocation4 + $0x1], 0 }
   0x8   :  { %16 = vsyncpa [#allocation11], 0 }
   0x9   :  { %18 = vsyncpa [#allocation11 + $0x1], 0  ;;  %s1115_s18 = smov 0   ;;  %s1117_s19 = smov 0  }
   0xa   :  { %s1119_s20 = smov 0   ;;  %s1121_s21 = smov 0  }
   0xb   :  { %s1123_s22 = smov 0   ;;  %s1125_s23 = smov 0  }
   0xc LB: > { %1576 = sst [smem:[#allocation17_spill]] %s1051_s18  ;;  %s1146_s24 = sadd.s32 4294967295, %s1071_s23   ;;  %s1071_s23 = sphi %s1125_s23, %s24_s23   ;;  %s1067_s22 = sphi %s1123_s22, %s1620_s22   ;;  %s1063_s21 = sphi %s1121_s21, %s1619_s21   ;;  %s1059_s20 = sphi %s1119_s20, %s1615_s20   ;;  %s1055_s19 = sphi %s1117_s19, %s1618_s19   ;;  %s1051_s18 = sphi %s1115_s18, %s1617_s18  }
   0xd   : > { %1577 = sst [smem:[#allocation18_spill]] %s1059_s20  ;;  %s704_s25 = sadd.s32 4294967294, %s1071_s23  }
   0xe   : > { %1578 = sst [smem:[#allocation19_spill]] %s1071_s23  ;;  %s97_s26 = sadd.s32 1, %s1059_s20 }
   0xf   : > { %p104_p0 = scmp.ne.s32.totalorder %s1059_s20, %s1055_s19  ;;  %p105_p1 = scmp.eq.s32.totalorder %s1071_s23, 0 }
  0x10   : > { %p110_p2 = scmp.ne.s32.totalorder %s1055_s19, %s1051_s18  ;;  %p1557_p3 = scmp.eq.s32.totalorder %s1146_s24, 0 }
  0x11   : > { %p164_p4 = scmp.eq.s32.totalorder %s1146_s24, 1  ;;  %p1157_p5 = por %p105_p1, %p104_p0 }
  0x12   : > { %p170_p6 = scmp.eq.s32.totalorder %s704_s25, 1  ;;  %p1163_p7 = por %p1557_p3, %p110_p2 }
  0x13   : > { %p1167_p8 = por %p164_p4, %p104_p0  ;;  %p705_p10 = scmp.ge.s32.totalorder %s1071_s23, 1 }
  0x14   : > { %s1580_s28 = scalar_select %p1163_p7, 1, 0 }
  0x15   : > { %s1581_s29 = scalar_select %p1167_p8, 1, 0 }
  0x16   : > { %p1171_p9 = por %p170_p6, %p110_p2  ;;  %p205_p11 = scmp.lt.s32.totalorder %s1071_s23, 3 }
  0x17   : > { %s1073_s7 = smov [#allocation2]   ;;  %p773_p1 = scmp.lt.s32.totalorder %s1071_s23, 2 }
  0x18   : > { %s1582_s30 = scalar_select %p1171_p9, 1, 0 }
  0x19   : > { %p1178_p13 = pnand %p705_p10, %p205_p11  ;;  %s220_s8 = sshll.u32 %s1073_s7, 4  ;;  %s221_s8 = int_to_ptr.vmem [resolvable:$true] %s220_s8 }
  0x1a   : > { %1583 = sst [smem:[#allocation20_spill]] %s1582_s30  ;;  %p1187_p4 = pnand %p773_p1, %p1157_p5 }
  0x1b   : > { %s1584_s6 = scalar_select %p1178_p13, 1, 0 }
  0x1c   : > { %p750_p0 = pneg %p1178_p13  ;;  %s36_s11 = sadd.s32 1, %s1067_s22 }
  0x1d   : > { %s1585_s9 = scalar_select %p1187_p4, 1, 0 }
  0x1e   : > { %p1193_p2 = pnand %p750_p0, %p1557_p3  ;;  %p1198_p6 = scmp.ge.s32.totalorder %s36_s11, 2 }
  0x1f   : > { %s1588_s0 = sld [smem:[#allocation23_spill]] }
  0x20   : > { %s1587_s12 = scalar_select %p1198_p6, 1, 0 }
  0x21   : > { %p1563_p10 = pneg %p1193_p2 }
  0x25   : > { %s833_s16 = scalar_lea.hbm %s1588_s0, 128 }
  0x26   : > { %p834_p5 = scmp.ne.s32.totalorder %s1588_s0, %s833_s16  ;;  %p840_p0 = scmp.lt.u32.totalorder %s833_s16, %s1588_s0 }
  0x28   : > { %p836_p11 = pnand %p1563_p10, %p834_p5 }
  0x2a   : > { %p837_p1 = pneg %p836_p11 }
  0x2c   : > { %p842_p12 = pnand %p840_p0, %p837_p1 }
  0x2e   : > { %845 = shalt.err (!%p842_p12)
}
  0x2f   : > { %s846_s13 = scalar_lea.vmem %s221_s8, 128  ;;  %p854_p7 = scmp.lt.s32.totalorder %s221_s8, %s221_s8 }
  0x30   : > { %p847_p3 = scmp.ne.s32.totalorder %s221_s8, %s846_s13  ;;  %p855_p13 = scmp.lt.s32.totalorder %s846_s13, %s846_s13 }
  0x32   : > { %p849_p9 = pnand %p847_p3, %p1563_p10  ;;  %p856_p4 = por %p855_p13, %p854_p7 }
  0x34   : > { %p850_p8 = pneg %p849_p9 }
  0x36   : > { %p857_p6 = pnand %p856_p4, %p850_p8 }
  0x38   : > { %860 = shalt.err (!%p857_p6)
}
  0x39   : > { %753 = dma.hbm_to_vmem [thread:$0]  (!%p1193_p2), %s1588_s0, 128, %s221_s8, [#allocation3]  }
  0x3a   : > { %p1589_p3 = scmp.ne.s32.totalorder %s1587_s12, 0  ;;  %s246_s13 = sand.u32 1, %s1059_s20  }
  0x3b   : > { %s1232_s17 = sshll.u32 %s246_s13, 5  ;;  %s1562_s25 = sshll.u32 %s1067_s22, 9 }
  0x3c   : > { %s1622_s11 = smov (%p1589_p3, %s36_s11), 0  ;;  %s248_s27 = scalar_lea.vmem [#allocation7], %s1232_s17 }
  0x3d   : > { %1590 = sst [smem:[#allocation21_spill]] %s1622_s11  ;;  %s92_s16 = ssub.s32 %s1067_s22, %s1622_s11 }
  0x3e   : > { %p95_p7 = scmp.eq.s32.totalorder %s92_s16, 0  ;;  %s256_s7 = sshll.u32 %s248_s27, 4  ;;  %s1248_s7 = int_to_ptr.vmem [resolvable:$true] %s256_s7 }
  0x3f   : > { %s1592_s2 = sld [smem:[#allocation24_spill]]  ;;  %s1593_s13 = sand.u32 1, %s1071_s23  }
  0x40   : > { %s1239_s14 = scalar_select %p95_p7, %s1059_s20, %s97_s26  }
  0x41   : > { %s1252_s16 = scalar_lea.sflag [#allocation3], %s1593_s13  ;;  %p1594_p9 = scmp.ne.s32.totalorder %s1585_s9, 0 }
  0x42   : > { %1591 = sst [smem:[#allocation22_spill]] %s1239_s14 }
  0x43   : > { %p1571_p12 = pneg %p1594_p9 }
  0x45   : > { %s1246_s12 = scalar_lea.hbm %s1592_s2, %s1562_s25  ;;  %s866_s15 = scalar_lea.hbm %s1592_s2, 1024 }
  0x46   : > { %s861_s0 = scalar_lea.hbm %s1246_s12, 512  ;;  %p867_p6 = scmp.lt.u32.totalorder %s1246_s12, %s1592_s2 }
  0x47   : > { %p862_p8 = scmp.ne.s32.totalorder %s1246_s12, %s861_s0  ;;  %p868_p5 = scmp.lt.u32.totalorder %s866_s15, %s861_s0 }
  0x48   : > { %p870_p1 = scmp.lt.u32.totalorder %s861_s0, %s1246_s12 }
  0x49   : > { %p864_p13 = pnand %p1571_p12, %p862_p8  ;;  %p869_p11 = por %p868_p5, %p867_p6 }
  0x4b   : > { %p865_p4 = pneg %p864_p13  ;;  %p871_p0 = por %p870_p1, %p869_p11 }
  0x4d   : > { %p872_p3 = pnand %p871_p0, %p865_p4 }
  0x4f   : > { %875 = shalt.err (!%p872_p3)
}
  0x50   : > { %s876_s13 = scalar_lea.vmem %s1248_s7, 512  ;;  %s1074_s26 = smov [#allocation7]  }
  0x51   : > { %p877_p7 = scmp.ne.s32.totalorder %s1248_s7, %s876_s13  ;;  %s881_s27 = sshll.u32 %s1074_s26, 4  ;;  %s882_s27 = int_to_ptr.vmem [resolvable:$false] %s881_s27 }
  0x52   : > { %s883_s25 = scalar_lea.vmem %s882_s27, 1024  ;;  %p884_p10 = scmp.lt.s32.totalorder %s1248_s7, %s882_s27 }
  0x53   : > { %p879_p8 = pnand %p877_p7, %p1571_p12  ;;  %p885_p6 = scmp.lt.s32.totalorder %s883_s25, %s876_s13 }
  0x55   : > { %p880_p13 = pneg %p879_p8  ;;  %p886_p5 = por %p885_p6, %p884_p10 }
  0x57   : > { %p887_p11 = pnand %p886_p5, %p880_p13 }
  0x59   : > { %890 = shalt.err (!%p887_p11)
}
  0x5a   : > { %s1075_s0 = smov 128   ;;  %s1076_s15 = smov 8  }
  0x5b   : > { %760 = dma.hbm_to_vmem [thread:$0]  (!%p1594_p9), %s1246_s12, 512, %s1248_s7, %s1252_s16, %s1075_s0, %s1075_s0, %s1076_s15  }
  0x5c   : > { %s1077_s8 = smov [#allocation5]   ;;  %s1595_s13 = sshll.u32 %s1067_s22, 9 }
  0x5d   : > { %s233_s26 = sshll.u32 %s1077_s8, 4  ;;  %s1288_s2 = scalar_lea.hbm %s1554_s3, %s1595_s13  ;;  %s234_s26 = int_to_ptr.vmem [resolvable:$true] %s233_s26 }
  0x5e   : > { %s270_s11 = scalar_lea.vmem [#allocation8], %s1232_s17  ;;  %s891_s30 = scalar_lea.hbm %s1552_s1, 128 }
  0x5f   : > { %s278_s14 = sshll.u32 %s270_s11, 4  ;;  %p892_p10 = scmp.ne.s32.totalorder %s1552_s1, %s891_s30  ;;  %s1311_s14 = int_to_ptr.vmem [resolvable:$true] %s278_s14 }
  0x60   : > { %p1596_p4 = pneg %p1193_p2  ;;  %p898_p3 = scmp.lt.u32.totalorder %s891_s30, %s1552_s1 }
  0x62   : > { %p894_p1 = pnand %p892_p10, %p1596_p4 }
  0x64   : > { %p895_p0 = pneg %p894_p1 }
  0x66   : > { %p900_p7 = pnand %p898_p3, %p895_p0 }
  0x68   : > { %903 = shalt.err (!%p900_p7)
}
  0x69   : > { %s904_s17 = scalar_lea.vmem %s234_s26, 128  ;;  %p1597_p13 = pmov %p1596_p4 }
  0x6a   : > { %p905_p8 = scmp.ne.s32.totalorder %s234_s26, %s904_s17  ;;  %p912_p11 = scmp.lt.s32.totalorder %s234_s26, %s234_s26 }
  0x6b   : > { %p913_p12 = scmp.lt.s32.totalorder %s904_s17, %s904_s17 }
  0x6c   : > { %p907_p6 = pnand %p905_p8, %p1597_p13 }
  0x6d   : > { %p914_p9 = por %p913_p12, %p912_p11 }
  0x6e   : > { %p908_p5 = pneg %p907_p6 }
  0x70   : > { %p915_p4 = pnand %p914_p9, %p908_p5 }
  0x72   : > { %918 = shalt.err (!%p915_p4)
}
  0x73   : > { %756 = dma.hbm_to_vmem [thread:$0]  (!%p1193_p2), %s1552_s1, 128, %s234_s26, [#allocation6]  }
  0x74   : > { %s919_s20 = scalar_lea.hbm %s1288_s2, 512  ;;  %p1598_p1 = scmp.ne.s32.totalorder %s1585_s9, 0 }
  0x75   : > { %p920_p10 = scmp.ne.s32.totalorder %s1288_s2, %s919_s20  ;;  %s924_s10 = scalar_lea.hbm %s1554_s3, 1024 }
  0x76   : > { %p1599_p0 = pneg %p1598_p1  ;;  %p925_p3 = scmp.lt.u32.totalorder %s1288_s2, %s1554_s3 }
  0x77   : > { %p926_p7 = scmp.lt.u32.totalorder %s924_s10, %s919_s20  ;;  %p928_p13 = scmp.lt.u32.totalorder %s919_s20, %s1288_s2 }
  0x78   : > { %p922_p12 = pnand %p920_p10, %p1599_p0 }
  0x79   : > { %p927_p8 = por %p926_p7, %p925_p3 }
  0x7a   : > { %p923_p9 = pneg %p922_p12 }
  0x7b   : > { %p929_p2 = por %p928_p13, %p927_p8 }
  0x7d   : > { %p930_p6 = pnand %p929_p2, %p923_p9 }
  0x7f   : > { %933 = shalt.err (!%p930_p6)
}
  0x80   : > { %s934_s26 = scalar_lea.vmem %s1311_s14, 512  ;;  %p1600_p11 = pmov %p1599_p0 }
  0x81   : > { %p935_p5 = scmp.ne.s32.totalorder %s1311_s14, %s934_s26  ;;  %s1078_s13 = smov [#allocation8]  }
  0x82   : > { %s939_s27 = sshll.u32 %s1078_s13, 4  ;;  %s940_s27 = int_to_ptr.vmem [resolvable:$false] %s939_s27 }
  0x83   : > { %p937_p4 = pnand %p935_p5, %p1600_p11  ;;  %s941_s25 = scalar_lea.vmem %s940_s27, 1024 }
  0x84   : > { %p942_p0 = scmp.lt.s32.totalorder %s1311_s14, %s940_s27  ;;  %p943_p12 = scmp.lt.s32.totalorder %s941_s25, %s934_s26 }
  0x85   : > { %p938_p10 = pneg %p937_p4 }
  0x86   : > { %p944_p3 = por %p943_p12, %p942_p0 }
  0x88   : > { %p945_p7 = pnand %p944_p3, %p938_p10 }
  0x8a   : > { %948 = shalt.err (!%p945_p7)
}
  0x8b   : > { %763 = dma.hbm_to_vmem [thread:$0]  (!%p1598_p1), %s1288_s2, 512, %s1311_s14, %s1252_s16, %s1075_s0, %s1075_s0, %s1076_s15  }
  0x8c   : > { %p1601_p9 = scmp.ne.s32.totalorder %s1584_s6, 0 }
  0x8d   : > { %p1602_p8 = scmp.eq.s32.totalorder (!%p1601_p9), %s1146_s24, 0 }
  0x8e   : > { %290 = sbr.rel (%p1601_p9) target bundleno = 442 (0x1ba), region = 36 }
  0x95   : > { %1030 = dma.done.wait (%p1602_p8), [#allocation3], 128   ;;  %p1603_p13 = pmov %p1602_p8 }
  0x96   : > { %p1604_p2 = pmov %p1602_p8 }
  0x97   : > { %1032 = vsyncadd (%p1603_p13), [#allocation3], 4294967168 }
  0x98   : > { %1034 = dma.done.wait (%p1604_p2), [#allocation6], 128   ;;  %p1605_p6 = pmov %p1604_p2 }
  0x99   : > { %s300_s9 = sand.u32 1, %s1146_s24   ;;  %s1352_s2 = sand.u32 1, %s1055_s19  }
  0x9a   : > { %1036 = vsyncadd (%p1605_p6), [#allocation6], 4294967168  ;;  %s1355_s6 = sshll.u32 %s1352_s2, 5  ;;  %s301_s14 = scalar_lea.sflag [#allocation3], %s300_s9 }
  0x9b   : > { %s304_s16 = scalar_lea.vmem [#allocation7], %s1355_s6  ;;  %p1606_p1 = scmp.ne.s32.totalorder %s1580_s28, 0 }
  0x9d   : > { %1038 = dma.done.wait (%p1606_p1), %s301_s14, 1024  }
  0x9e   : > { %1040 = vsyncadd (%p1606_p1), %s301_s14, 4294966272  ;;  %v355_v0 = vld [vmem:[#allocation5] sm:$0xff]  ;;  %v1362_v1 = vld [vmem:[%s304_s16 + $0x8] sm:$0xff]  ;;  %s1079_s0 = smov 16   ;;  %s1373_s24 = scalar_lea.vmem [#allocation8], %s1355_s6  ;;  %vm428_vm0 = vcmask 130048  }
  0x9f   : > { %369 = vrot.lane.b32.xlu0 %v355_v0, %s1079_s0  ;;  %v405_v2 = vmul.f32 %v1362_v1, %v355_v0  ;;  %v1366_v3 = vld [vmem:[%s304_s16 + $0x18] sm:$0xff]  ;;  %v1368_v4 = vld [vmem:[#allocation2] sm:$0xff]  ;;  %v356_v5 = vld [vmem:[%s304_s16] sm:$0xff]  ;;  %s1080_s28 = smov 112   ;;  %vm493_vm1 = vcmask 261120   ;;  %s342_s15 = scalar_lea.vmem [#allocation9], %s1355_s6 }
  0xa0   : > { %v407_v6 = vmul.f32 %v1366_v3, %v355_v0  ;;  %v1376_v7 = vld [vmem:[%s1373_s24 + $0x8] sm:$0xff]  ;;  %v404_v8 = vmul.f32 %v356_v5, %v355_v0  ;;  %v358_v9 = vld [vmem:[%s304_s16 + $0x10] sm:$0xff]  ;;  %v360_v12 = vld [vmem:[%s1373_s24] sm:$0xff]  ;;  %v364_v36 = vmul.f32 %v356_v5, %v1368_v4  ;;  %v365_v42 = vmul.f32 %v1362_v1, %v1368_v4  ;;  %s522_s7 = sshll.u32 %s342_s15, 4  ;;  %s732_s12 = sshll.u32 %s1063_s21, 9  ;;  %s1426_s7 = int_to_ptr.vmem [resolvable:$true] %s522_s7 }
  0xa1   : > { %414 = vrot.lane.b32.xlu1 %v405_v2, %s1079_s0  ;;  %v466_v10 = vmul.f32 %v1376_v7, %v355_v0  ;;  %v406_v11 = vmul.f32 %v358_v9, %v355_v0  ;;  %v465_v13 = vmul.f32 %v360_v12, %v355_v0  ;;  %v1389_v19 = vld [vmem:[%s1373_s24 + $0x10] sm:$0xff]  ;;  %v1396_v24 = vld [vmem:[%s1373_s24 + $0x18] sm:$0xff]  ;;  %v366_v37 = vmul.f32 %v358_v9, %v1368_v4  ;;  %s1430_s17 = scalar_lea.vmem [#allocation10], %s1355_s6  ;;  %s1445_s20 = scalar_lea.hbm %s1555_s4, %s732_s12 }
  0xa2   : > { %v467_v22 = vmul.f32 %v1389_v19, %v355_v0  ;;  %v468_v26 = vmul.f32 %v1396_v24, %v355_v0  ;;  %v433_v43 = vmul.f32 %v360_v12, %v1368_v4  ;;  %v367_v53 = vmul.f32 %v1366_v3, %v1368_v4  ;;  %s503_s23 = scalar_lea.sflag [#allocation4], %s1352_s2  ;;  %s949_s30 = scalar_lea.vmem %s1426_s7, 512 }
  0xa3   : > { %397 = vrot.lane.b32.xlu0 %v1368_v4, %s1079_s0  ;;  %v435_v62 = vmul.f32 %v1389_v19, %v1368_v4  ;;  %v434_v2 = vmul.f32 %v1376_v7, %v1368_v4  ;;  %p950_p5 = scmp.ne.s32.totalorder %s1426_s7, %s949_s30  ;;  %p1607_p11 = scmp.ne.s32.totalorder %s1581_s29, 0 }
  0xa4   : > { %s1081_s10 = smov [#allocation9]  }
  0xa5   : > { %418 = vrot.lane.b32.xlu1 %v407_v6, %s1079_s0  ;;  %p951_p4 = pnand %p950_p5, %p1607_p11  ;;  %s953_s11 = sshll.u32 %s1081_s10, 4  ;;  %s954_s11 = int_to_ptr.vmem [resolvable:$false] %s953_s11 }
  0xa6   : > { %s955_s8 = scalar_lea.vmem %s954_s11, 1024  ;;  %p956_p0 = scmp.lt.s32.totalorder %s1426_s7, %s954_s11 }
  0xa7   : > { %412 = vrot.lane.b32.xlu0 %v404_v8, %s1079_s0  ;;  %p952_p10 = pneg %p951_p4  ;;  %p957_p12 = scmp.lt.s32.totalorder %s955_s8, %s949_s30 }
  0xa9   : > { %475 = vrot.lane.b32.xlu1 %v466_v10, %s1079_s0  ;;  %p958_p3 = por %p957_p12, %p956_p0 }
  0xab   : > { %416 = vrot.lane.b32.xlu0 %v406_v11, %s1079_s0  ;;  %p959_p7 = pnand %p958_p3, %p952_p10 }
  0xaf   : > { %473 = vrot.lane.b32.xlu0 %v465_v13, %s1079_s0 }
 0x111   : > { %v370_v14 = vpop.permute.xlu0 %369 }
 0x112   : > { %v372_v15 = vmul.f32 %v370_v14, %v356_v5  ;;  %v374_v16 = vmul.f32 %v370_v14, %v358_v9  ;;  %v373_v17 = vmul.f32 %v370_v14, %v1362_v1  ;;  %v437_v18 = vmul.f32 %v370_v14, %v360_v12 }
 0x113   : > { %v375_v20 = vmul.f32 %v370_v14, %v1366_v3  ;;  %v439_v21 = vmul.f32 %v370_v14, %v1389_v19  ;;  %v438_v23 = vmul.f32 %v370_v14, %v1376_v7  ;;  %v440_v25 = vmul.f32 %v370_v14, %v1396_v24  ;;  %v415_v28 = vpop.permute.xlu1 %414 }
 0x114   : > { %380 = vrot.lane.b32.xlu1 %v372_v15, %s1080_s28  ;;  %384 = vrot.lane.b32.xlu0 %v374_v16, %s1080_s28 }
 0x115   : > { %v1402_v27 = vpop.permute.xlu0 %397 }
 0x116   : > { %v400_v34 = vmul.f32 %v1402_v27, %v356_v5  ;;  %v402_v35 = vmul.f32 %v1402_v27, %v358_v9  ;;  %v401_v38 = vmul.f32 %v1402_v27, %v1362_v1  ;;  %v461_v39 = vmul.f32 %v1402_v27, %v360_v12 }
 0x117   : > { %v419_v30 = vpop.permute.xlu1 %418  ;;  %v403_v50 = vmul.f32 %v1402_v27, %v1366_v3  ;;  %v462_v0 = vmul.f32 %v1402_v27, %v1376_v7  ;;  %v463_v5 = vmul.f32 %v1402_v27, %v1389_v19 }
 0x118   : > { %382 = vrot.lane.b32.xlu1 %v373_v17, %s1080_s28  ;;  %445 = vrot.lane.b32.xlu0 %v437_v18, %s1080_s28  ;;  %v425_v54 = vadd.f32 %v415_v28, %v401_v38 }
 0x119   : > { %v413_v29 = vpop.permute.xlu0 %412  ;;  %v427_v63 = vadd.f32 %v419_v30, %v403_v50 }
 0x11a   : > { %v424_v44 = vadd.f32 %v413_v29, %v400_v34 }
 0x11b   : > { %v476_v32 = vpop.permute.xlu1 %475 }
 0x11c   : > { %386 = vrot.lane.b32.xlu1 %v375_v20, %s1080_s28  ;;  %449 = vrot.lane.b32.xlu0 %v439_v21, %s1080_s28  ;;  %v486_v9 = vadd.f32 %v476_v32, %v462_v0 }
 0x11d   : > { %v417_v31 = vpop.permute.xlu0 %416 }
 0x11e   : > { %v426_v45 = vadd.f32 %v417_v31, %v402_v35 }
 0x120   : > { %447 = vrot.lane.b32.xlu1 %v438_v23, %s1080_s28  ;;  %477 = vrot.lane.b32.xlu0 %v467_v22, %s1079_s0 }
 0x121   : > { %v474_v33 = vpop.permute.xlu0 %473 }
 0x122   : > { %v485_v55 = vadd.f32 %v474_v33, %v461_v39 }
 0x124   : > { %451 = vrot.lane.b32.xlu1 %v440_v25, %s1080_s28 }
 0x128   : > { %479 = vrot.lane.b32.xlu1 %v468_v26, %s1079_s0 }
 0x186   : > { %v381_v40 = vpop.permute.xlu1 %380  ;;  %v385_v41 = vpop.permute.xlu0 %384 }
 0x187   : > { %v392_v46 = vsub.f32 %v364_v36, %v381_v40  ;;  %v394_v47 = vsub.f32 %v366_v37, %v385_v41 }
 0x189   : > { %v429_v48 = vsel %vm428_vm0, %v392_v46, %v424_v44  ;;  %v431_v49 = vsel %vm428_vm0, %v394_v47, %v426_v45 }
 0x18a   : > { %494 = vst.msk [vmem:[%s342_s15] sm:$0xff] %vm493_vm1, %v429_v48  ;;  %496 = vst.msk [vmem:[%s342_s15 + $0x10] sm:$0xff] %vm493_vm1, %v431_v49  ;;  %v383_v51 = vpop.permute.xlu1 %382  ;;  %v446_v52 = vpop.permute.xlu0 %445 }
 0x18b   : > { %v393_v56 = vsub.f32 %v365_v42, %v383_v51  ;;  %v457_v57 = vsub.f32 %v433_v43, %v446_v52 }
 0x18d   : > { %v430_v58 = vsel %vm428_vm0, %v393_v56, %v425_v54  ;;  %v489_v59 = vsel %vm428_vm0, %v457_v57, %v485_v55 }
 0x18e   : > { %495 = vst.msk [vmem:[%s342_s15 + $0x8] sm:$0xff] %vm493_vm1, %v430_v58  ;;  %498 = vst.msk [vmem:[%s1430_s17] sm:$0xff] %vm493_vm1, %v489_v59  ;;  %v387_v60 = vpop.permute.xlu1 %386  ;;  %v450_v61 = vpop.permute.xlu0 %449 }
 0x18f   : > { %v395_v1 = vsub.f32 %v367_v53, %v387_v60  ;;  %v459_v10 = vsub.f32 %v435_v62, %v450_v61 }
 0x191   : > { %v432_v3 = vsel %vm428_vm0, %v395_v1, %v427_v63 }
 0x192   : > { %497 = vst.msk [vmem:[%s342_s15 + $0x18] sm:$0xff] %vm493_vm1, %v432_v3  ;;  %v448_v6 = vpop.permute.xlu1 %447  ;;  %v478_v8 = vpop.permute.xlu0 %477 }
 0x193   : > { %v458_v11 = vsub.f32 %v434_v2, %v448_v6  ;;  %v487_v7 = vadd.f32 %v478_v8, %v463_v5 }
 0x194   : > { %962 = shalt.err (!%p959_p7)
}
 0x195   : > { %s963_s26 = scalar_lea.hbm %s1445_s20, 512  ;;  %s967_s25 = scalar_lea.hbm %s1555_s4, 1024 }
 0x196   : > { %p964_p9 = scmp.ne.s32.totalorder %s1445_s20, %s963_s26  ;;  %p968_p2 = scmp.lt.u32.totalorder %s1445_s20, %s1555_s4 }
 0x197   : > { %p969_p6 = scmp.lt.u32.totalorder %s967_s25, %s963_s26  ;;  %p971_p5 = scmp.lt.u32.totalorder %s963_s26, %s1445_s20 }
 0x198   : > { %p965_p8 = pnand %p964_p9, %p1607_p11 }
 0x199   : > { %p970_p1 = por %p969_p6, %p968_p2 }
 0x19a   : > { %p966_p13 = pneg %p965_p8 }
 0x19b   : > { %p972_p4 = por %p971_p5, %p970_p1 }
 0x19d   : > { %p973_p10 = pnand %p972_p4, %p966_p13 }
 0x19f   : > { %976 = shalt.err (!%p973_p10)
}
 0x1a0   : > { %s1082_s14 = smov 128   ;;  %s1083_s16 = smov 8   ;;  %v490_v12 = vsel %vm428_vm0, %v458_v11, %v486_v9  ;;  %v491_v13 = vsel %vm428_vm0, %v459_v10, %v487_v7  ;;  %v452_v14 = vpop.permute.xlu1 %451  ;;  %v436_v15 = vmul.f32 %v1396_v24, %v1368_v4  ;;  %v464_v16 = vmul.f32 %v1402_v27, %v1396_v24 }
 0x1a1   : > { %746 = dma.vmem_to_hbm [thread:$0]  (%p1607_p11), %s1426_s7, 512, %s1445_s20, %s503_s23, %s1082_s14, %s1082_s14, %s1083_s16  }
 0x1a2   : > { %499 = vst.msk [vmem:[%s1430_s17 + $0x8] sm:$0xff] %vm493_vm1, %v490_v12  ;;  %500 = vst.msk [vmem:[%s1430_s17 + $0x10] sm:$0xff] %vm493_vm1, %v491_v13  ;;  %s539_s0 = sshll.u32 %s1430_s17, 4  ;;  %v460_v18 = vsub.f32 %v436_v15, %v452_v14  ;;  %s1608_s15 = sld [smem:[#allocation25_spill]]  ;;  %s1489_s0 = int_to_ptr.vmem [resolvable:$true] %s539_s0 }
 0x1a3   : > { %s508_s5 = scalar_lea.sflag [#allocation11], %s1352_s2  ;;  %s977_s18 = scalar_lea.vmem %s1489_s0, 512 }
 0x1a4   : > { %v480_v17 = vpop.permute.xlu1 %479  ;;  %p978_p0 = scmp.ne.s32.totalorder %s1489_s0, %s977_s18  ;;  %s1084_s20 = smov [#allocation10]  }
 0x1a5   : > { %v488_v19 = vadd.f32 %v480_v17, %v464_v16  ;;  %s981_s23 = sshll.u32 %s1084_s20, 4  ;;  %s982_s23 = int_to_ptr.vmem [resolvable:$false] %s981_s23 }
 0x1a6   : > { %p979_p12 = pnand %p978_p0, %p1607_p11  ;;  %s983_s30 = scalar_lea.vmem %s982_s23, 1024 }
 0x1a7   : > { %v492_v4 = vsel %vm428_vm0, %v460_v18, %v488_v19  ;;  %p984_p7 = scmp.lt.s32.totalorder %s1489_s0, %s982_s23  ;;  %p985_p9 = scmp.lt.s32.totalorder %s983_s30, %s977_s18 }
 0x1a8   : > { %s1496_s7 = scalar_lea.hbm %s1608_s15, %s732_s12  ;;  %501 = vst.msk [vmem:[%s1430_s17 + $0x18] sm:$0xff] %vm493_vm1, %v492_v4  ;;  %p980_p3 = pneg %p979_p12 }
 0x1a9   : > { %p986_p8 = por %p985_p9, %p984_p7 }
 0x1ab   : > { %p987_p13 = pnand %p986_p8, %p980_p3 }
 0x1ad   : > { %990 = shalt.err (!%p987_p13)
}
 0x1ae   : > { %s991_s21 = scalar_lea.hbm %s1496_s7, 512  ;;  %s995_s10 = scalar_lea.hbm %s1608_s15, 1024 }
 0x1af   : > { %p992_p2 = scmp.ne.s32.totalorder %s1496_s7, %s991_s21  ;;  %p996_p5 = scmp.lt.u32.totalorder %s1496_s7, %s1608_s15 }
 0x1b0   : > { %p997_p4 = scmp.lt.u32.totalorder %s995_s10, %s991_s21  ;;  %p999_p0 = scmp.lt.u32.totalorder %s991_s21, %s1496_s7 }
 0x1b1   : > { %p993_p6 = pnand %p992_p2, %p1607_p11 }
 0x1b2   : > { %p998_p10 = por %p997_p4, %p996_p5 }
 0x1b3   : > { %p994_p1 = pneg %p993_p6 }
 0x1b4   : > { %p1000_p12 = por %p999_p0, %p998_p10 }
 0x1b6   : > { %p1001_p3 = pnand %p1000_p12, %p994_p1 }
 0x1b8   : > { %1004 = shalt.err (!%p1001_p3)
}
 0x1b9   : > { %747 = dma.vmem_to_hbm [thread:$0]  (%p1607_p11), %s1489_s0, 512, %s1496_s7, %s508_s5, %s1082_s14, %s1082_s14, %s1083_s16  }
 0x1ba PF: > { %s1609_s26 = sld [smem:[#allocation17_spill]]  ;;  %s1610_s13 = sld [smem:[#allocation20_spill]] }
 0x1bb   : > { %s1611_s27 = sld [smem:[#allocation19_spill]] }
 0x1c0   : > { %s554_s25 = sand.u32 1, %s1609_s26   ;;  %p1612_p7 = scmp.ne.s32.totalorder %s1610_s13, 0 }
 0x1c1   : > { %p1613_p9 = scmp.ge.s32.totalorder %s1611_s27, 2  ;;  %s555_s9 = scalar_lea.sflag [#allocation4], %s554_s25 }
 0x1c3   : > { %p765_p8 = pnand %p1613_p9, %p1612_p7 }
 0x1c5   : > { %1042 = dma.done.wait (!%p765_p8), %s555_s9, 512  }
 0x1c6   : > { %1044 = vsyncadd (!%p765_p8), %s555_s9, 4294966784  ;;  %s564_s29 = scalar_lea.sflag [#allocation11], %s554_s25 }
 0x1c7   : > { %1046 = dma.done.wait (!%p765_p8), %s564_s29, 512  }
 0x1c8   : > { %1048 = vsyncadd (!%p765_p8), %s564_s29, 4294966784  ;;  %s24_s23 = sadd.s32 1, %s1611_s27   ;;  %s1614_s2 = sld [smem:[#allocation18_spill]] }
 0x1c9   : > { %p21_p13 = scmp.ge.s32.totalorder %s24_s23, 4   ;;  %s1615_s20 = sld [smem:[#allocation22_spill]] }
 0x1ca   : > { %s1616_s6 = sld [smem:[#allocation21_spill]]  ;;  %s1617_s18 = smov %s1055_s19 }
 0x1cb   : > { %s1619_s21 = smov %s1067_s22  ;;  %23 = sbr.rel (!%p21_p13) target bundleno = 12 (0xc), region = 118 }
 0x1ce   : > { %s1618_s19 = smov %s1614_s2 }
 0x1d0   : > { %s1620_s22 = smov %s1616_s6 }
 0x1d2   :  { %569 = vsyncpa [#allocation3], 1 }
 0x1d3   :  { %571 = vsyncpa [#allocation3 + $0x1], 1 }
 0x1d4   :  { %572 = vsyncpa [#allocation6], 1 }
 0x1d5   :  { %573 = vsyncpa [#allocation4], 1 }
 0x1d6   :  { %575 = vsyncpa [#allocation4 + $0x1], 1 }
 0x1d7   :  { %576 = vsyncpa [#allocation11], 1 }
 0x1d8   :  { %578 = vsyncpa [#allocation11 + $0x1], 1 }

</bundles_post_ra>
